<compile_context>
chip_gen: v6e
topology: v6e:2x2x1
jax: 0.10.0
libtpu: 0.0.40
codegen_flags: <defaults>
</compile_context>

<pallas_src>
import jax
import jax.numpy as jnp
from jax.experimental import pallas as pl
from jax.experimental.pallas import tpu as pltpu

K = 5            # conv kernel size (all three convs)
PAD = 2          # 'same' padding for k=5, stride=1
C1, C2 = 32, 64  # channel counts
WIN = 8          # conv1 polyphase window (6 taps + bias column + zero pad)


def ae_kernel(xwin_ref, w1_ref, w2_ref, b2_ref, w3_ref, b3_ref, o_ref,
              pp_ref, ic_ref, hp_ref):
    # xwin_ref: (L2, TB, WIN)   6-tap input window per pooled position (+1.0, 0)
    # w1_ref  : (WIN, 2*C1)     [even-phase | odd-phase] conv1 taps, bias in row 6
    # w2_ref  : (K*C1, C2)      conv2 weights, K-packed along the contraction dim
    # b2_ref  : (1, C2)
    # w3_ref  : (6, C2)         pre-combined conv3 weights (even: rows 0-2, odd: 3-5)
    # b3_ref  : (1, 1)
    # o_ref   : (2, TB, L2)     [even | odd] output samples, batch-major
    # pp_ref  : (L2+4, TB, C1)  pooled activations + 2-row zero halo   (scratch)
    # ic_ref  : (L2, TB, K*C1)  conv2 im2col                           (scratch)
    # hp_ref  : (L2+2, TB, C2)  conv2 activations + 1-row zero halo    (scratch)
    L2, TB, _ = xwin_ref.shape
    M = L2 * TB

    # ---- Conv1d(1->32, k5, same) + ReLU + MaxPool1d(2): one polyphase matmul
    xw = xwin_ref[...].reshape(M, WIN)
    d = jnp.dot(xw, w1_ref[...], preferred_element_type=jnp.float32)   # (M, 2*C1)
    pooled = jnp.maximum(jnp.maximum(d[:, :C1], d[:, C1:2 * C1]), 0.0)  # (M, C1)

    pp_ref[0:PAD] = jnp.zeros((PAD, TB, C1), jnp.float32)
    pp_ref[PAD + L2:PAD + L2 + PAD] = jnp.zeros((PAD, TB, C1), jnp.float32)
    pp_ref[PAD:PAD + L2] = pooled.reshape(L2, TB, C1)

    # ---- Conv1d(32->64, k5, same) + ReLU: K-packed im2col + ONE MXU matmul
    for k in range(K):                         # leading-dim reads are aligned
        ic_ref[:, :, k * C1:(k + 1) * C1] = pp_ref[k:k + L2]
    h2 = jnp.maximum(
        jnp.dot(ic_ref[...].reshape(M, K * C1), w2_ref[...],
                preferred_element_type=jnp.float32) + b2_ref[...], 0.0)  # (M, C2)

    hp_ref[0:1] = jnp.zeros((1, TB, C2), jnp.float32)
    hp_ref[1 + L2:2 + L2] = jnp.zeros((1, TB, C2), jnp.float32)
    hp_ref[1:1 + L2] = h2.reshape(L2, TB, C2)

    # ---- Upsample(x2 nearest) + Conv1d(64->1, k5, same), fused polyphase ----
    s0 = hp_ref[0:L2]            # h2[i-1]  (zero at the boundary)
    s1 = hp_ref[1:1 + L2]        # h2[i]
    s2 = hp_ref[2:2 + L2]        # h2[i+1]  (zero at the boundary)
    y_e = jnp.sum(s0 * w3_ref[0:1] + s1 * w3_ref[1:2] + s2 * w3_ref[2:3],
                  axis=-1) + b3_ref[...]                                # (L2, TB)
    y_o = jnp.sum(s0 * w3_ref[3:4] + s1 * w3_ref[4:5] + s2 * w3_ref[5:6],
                  axis=-1) + b3_ref[...]
    o_ref[0] = y_e.T             # (TB, L2)  batch-major store
    o_ref[1] = y_o.T


def _pick_tb(n_pad, l2, batch_block):
    """Batch tile: multiple of 8, divides n_pad, targets M = TB*L2 ~ 512-1024."""
    m_cap = max(8, (1024 // max(l2, 1)) // 8 * 8)
    tb = max(8, min(n_pad, (max(batch_block, 8) // 8) * 8, m_cap))
    tb = (tb // 8) * 8
    while n_pad % tb:
        tb -= 8
    if n_pad // tb < 2:           # keep >= 2 grid steps so both v7x cores get work
        half = (tb // 2 // 8) * 8
        if half >= 8 and n_pad % half == 0:
            tb = half
    return tb


def autoencoder_forward(x_ncl, params, *, batch_block=64):
    """SimpleAutoencoder forward. x_ncl: (N, 1, L) f32 (PyTorch NCL) -> (N, 1, L)."""
    w1, b1, w2, b2, w3, b3 = params   # PyTorch layouts: w (Cout, Cin, K), b (Cout,)
    N, c_in, L = x_ncl.shape
    assert c_in == 1
    assert L % 2 == 0, "MaxPool1d(2) needs an even length"
    L2 = L // 2

    n_pad = ((N + 7) // 8) * 8        # batch tile must be sublane-aligned
    x2 = x_ncl[:, 0, :].astype(jnp.float32)
    if n_pad != N:
        x2 = jnp.pad(x2, ((0, n_pad - N), (0, 0)))

    TB = _pick_tb(n_pad, L2, batch_block)
    grid = (n_pad // TB,)

    # ---- layout plumbing (plain XLA, outside the kernel) --------------------
    # conv1 polyphase window: win[b, i, j] = x[b, 2i - 2 + j], j in [0, 6);
    # column 6 carries a 1.0 so the conv1 bias rides inside the matmul.
    xp = jnp.pad(x2, ((0, 0), (PAD, PAD + 1)))                    # (n_pad, L + 5)
    cols = [xp[:, j:j + L:2] for j in range(6)]
    cols.append(jnp.ones((n_pad, L2), jnp.float32))
    cols.append(jnp.zeros((n_pad, L2), jnp.float32))
    xwin = jnp.transpose(jnp.stack(cols, axis=-1), (1, 0, 2))     # (L2, n_pad, WIN)

    w1t = jnp.transpose(w1[:, 0, :])                              # (K, C1) [tap, c]
    z1 = jnp.zeros((1, C1), jnp.float32)
    b1r = b1.reshape(1, C1)
    w1e = jnp.concatenate([w1t, z1, b1r, z1], axis=0)             # even phase (WIN, C1)
    w1o = jnp.concatenate([z1, w1t, b1r, z1], axis=0)             # odd phase  (WIN, C1)
    w1eo = jnp.concatenate([w1e, w1o], axis=1)                    # (WIN, 2*C1)

    w2p = jnp.transpose(w2, (2, 1, 0)).reshape(K * C1, C2)        # (K*C1, C2)
    b2r = b2.reshape(1, C2)

    w3d = w3[0]                                                   # (C2, K)
    w3c = jnp.stack([w3d[:, 0] + w3d[:, 1],   # even . h2[i-1]
                     w3d[:, 2] + w3d[:, 3],   # even . h2[i]
                     w3d[:, 4],               # even . h2[i+1]
                     w3d[:, 0],               # odd  . h2[i-1]
                     w3d[:, 1] + w3d[:, 2],   # odd  . h2[i]
                     w3d[:, 3] + w3d[:, 4]],  # odd  . h2[i+1]
                    axis=0)                                       # (6, C2)
    b3r = b3.reshape(1, 1)

    out = pl.pallas_call(
        ae_kernel,
        out_shape=jax.ShapeDtypeStruct((2, n_pad, L2), jnp.float32),
        grid_spec=pltpu.PrefetchScalarGridSpec(
            num_scalar_prefetch=0,
            grid=grid,
            in_specs=[
                pl.BlockSpec((L2, TB, WIN), lambda n: (0, n, 0)),   # xwin
                pl.BlockSpec((WIN, 2 * C1), lambda n: (0, 0)),      # w1eo
                pl.BlockSpec((K * C1, C2), lambda n: (0, 0)),       # w2p
                pl.BlockSpec((1, C2), lambda n: (0, 0)),            # b2
                pl.BlockSpec((6, C2), lambda n: (0, 0)),            # w3c
                pl.BlockSpec((1, 1), lambda n: (0, 0)),             # b3
            ],
            out_specs=pl.BlockSpec((2, TB, L2), lambda n: (0, n, 0)),
            scratch_shapes=[
                pltpu.VMEM((L2 + 2 * PAD, TB, C1), jnp.float32),    # pooled + halo
                pltpu.VMEM((L2, TB, K * C1), jnp.float32),          # conv2 im2col
                pltpu.VMEM((L2 + 2, TB, C2), jnp.float32),          # h2 + halo
            ],
        ),
        compiler_params=pltpu.CompilerParams(
            dimension_semantics=("parallel",),
            # well above the actual ~few-MiB per-step footprint; still safe on
            # v7x's 64 MiB per-TC VMEM, above the v5e/v6e scoped defaults.
            vmem_limit_bytes=48 * 1024 * 1024,
        ),
    )(xwin, w1eo, w2p, b2r, w3c, b3r)

    # interleave even/odd output samples back to full length (free reshape)
    y = jnp.stack([out[0, :N, :], out[1, :N, :]], axis=-1).reshape(N, L)
    return y[:, None, :]                                          # (N, 1, L)


# ----------------------- pure-JAX reference (for checking) -------------------
def reference_forward(x_ncl, params):
    w1, b1, w2, b2, w3, b3 = params     # PyTorch layouts

    def conv1d_same(x, w, b):
        y = jax.lax.conv_general_dilated(
            x, w, window_strides=(1,), padding=[(PAD, PAD)],
            dimension_numbers=("NCH", "OIH", "NCH"),
            precision=jax.lax.Precision.HIGHEST)
        return y + b.reshape(1, -1, 1)

    h = jax.nn.relu(conv1d_same(x_ncl, w1, b1))
    h = jax.lax.reduce_window(h, -jnp.inf, jax.lax.max,
                              (1, 1, 2), (1, 1, 2), "VALID")      # MaxPool1d(2)
    h = jax.nn.relu(conv1d_same(h, w2, b2))
    h = jnp.repeat(h, 2, axis=2)                                  # nearest x2
    return conv1d_same(h, w3, b3)


def init_params(key):
    ks = jax.random.split(key, 6)
    w1 = jax.random.normal(ks[0], (C1, 1, K), jnp.float32) * 0.3
    b1 = jax.random.normal(ks[1], (C1,), jnp.float32) * 0.1
    w2 = jax.random.normal(ks[2], (C2, C1, K), jnp.float32) * 0.1
    b2 = jax.random.normal(ks[3], (C2,), jnp.float32) * 0.1
    w3 = jax.random.normal(ks[4], (1, C2, K), jnp.float32) * 0.1
    b3 = jax.random.normal(ks[5], (1,), jnp.float32) * 0.1
    return (w1, b1, w2, b2, w3, b3)


if __name__ == "__main__":
    key = jax.random.PRNGKey(0)
    pkey, xkey = jax.random.split(key)
    params = init_params(pkey)

    N, L = 16, 16                     # batch = 16 (2 grid steps), max_length = 16
    x = jax.random.normal(xkey, (N, 1, L), jnp.float32)

    y = jax.block_until_ready(autoencoder_forward(x, params))
    y_ref = jax.block_until_ready(reference_forward(x, params))

    assert y.shape == (N, 1, L) and y.dtype == jnp.float32
    err = jnp.max(jnp.abs(y - y_ref))
    assert jnp.allclose(y, y_ref, rtol=1e-4, atol=1e-4), f"max abs err {err}"
    print("KERNEL_OK")
</pallas_src>

<mosaic_0001>
module attributes {stable_mosaic.version = 11 : i64} {
  func.func @ae_kernel(%arg0: i32, %arg1: memref<8x8x8xf32, #tpu.memory_space<vmem>>, %arg2: memref<8x64xf32, #tpu.memory_space<vmem>>, %arg3: memref<160x64xf32, #tpu.memory_space<vmem>>, %arg4: memref<1x64xf32, #tpu.memory_space<vmem>>, %arg5: memref<6x64xf32, #tpu.memory_space<vmem>>, %arg6: memref<1x1xf32, #tpu.memory_space<vmem>>, %arg7: memref<2x8x8xf32, #tpu.memory_space<vmem>>, %arg8: memref<12x8x32xf32, #tpu.memory_space<vmem>>, %arg9: memref<8x8x160xf32, #tpu.memory_space<vmem>>, %arg10: memref<10x8x64xf32, #tpu.memory_space<vmem>>) attributes {dimension_semantics = [#tpu.dimension_semantics<parallel>], iteration_bounds = array<i64: 2>, scalar_prefetch = 0 : i64, scratch_operands = 3 : i64, tpu.core_type = #tpu.core_type<tc>, window_params = [{transform_indices = @transform_0, window_bounds = array<i64: 8, 8, 8>}, {pipeline_mode = #tpu.pipeline_mode<synchronous>, transform_indices = @transform_1, window_bounds = array<i64: 8, 64>}, {pipeline_mode = #tpu.pipeline_mode<synchronous>, transform_indices = @transform_2, window_bounds = array<i64: 160, 64>}, {pipeline_mode = #tpu.pipeline_mode<synchronous>, transform_indices = @transform_3, window_bounds = array<i64: 1, 64>}, {pipeline_mode = #tpu.pipeline_mode<synchronous>, transform_indices = @transform_4, window_bounds = array<i64: 6, 64>}, {pipeline_mode = #tpu.pipeline_mode<synchronous>, transform_indices = @transform_5, window_bounds = array<i64: 1, 1>}, {transform_indices = @transform_6, window_bounds = array<i64: 2, 8, 8>}]} {
    %c0 = arith.constant 0 : index
    %c0_0 = arith.constant 0 : index
    %c0_1 = arith.constant 0 : index
    %0 = vector.load %arg1[%c0, %c0_0, %c0_1] : memref<8x8x8xf32, #tpu.memory_space<vmem>>, vector<8x8x8xf32>
    %1 = vector.shape_cast %0 : vector<8x8x8xf32> to vector<64x8xf32>
    %c0_2 = arith.constant 0 : index
    %c0_3 = arith.constant 0 : index
    %2 = vector.load %arg2[%c0_2, %c0_3] : memref<8x64xf32, #tpu.memory_space<vmem>>, vector<8x64xf32>
    %cst = arith.constant dense<0.000000e+00> : vector<64x64xf32>
    %3 = tpu.matmul %1, %2, %cst {dimension_numbers = #tpu.dot_dimension_numbers<[1], [0], [0], [1], [0, 0, 1, 1], [], []>} : vector<64x8xf32>, vector<8x64xf32>, vector<64x64xf32> -> vector<64x64xf32>
    %4 = vector.extract_strided_slice %3 {offsets = [0, 0], sizes = [64, 32], strides = [1, 1]} : vector<64x64xf32> to vector<64x32xf32>
    %5 = vector.extract_strided_slice %3 {offsets = [0, 32], sizes = [64, 32], strides = [1, 1]} : vector<64x64xf32> to vector<64x32xf32>
    %6 = arith.maximumf %4, %5 : vector<64x32xf32>
    %cst_4 = arith.constant 0.000000e+00 : f32
    %7 = vector.broadcast %cst_4 : f32 to vector<64x32xf32>
    %8 = arith.maximumf %6, %7 : vector<64x32xf32>
    %cst_5 = arith.constant 0.000000e+00 : f32
    %9 = vector.broadcast %cst_5 : f32 to vector<2x8x32xf32>
    %c0_6 = arith.constant 0 : index
    %c0_7 = arith.constant 0 : index
    %c0_8 = arith.constant 0 : index
    %10 = vector.load %arg8[%c0_6, %c0_7, %c0_8] : memref<12x8x32xf32, #tpu.memory_space<vmem>>, vector<2x8x32xf32>
    tpu.vector_store %arg8[%c0_6, %c0_7, %c0_8], %9 {strides = array<i32>} : memref<12x8x32xf32, #tpu.memory_space<vmem>>, vector<2x8x32xf32>,
    %cst_9 = arith.constant 0.000000e+00 : f32
    %11 = vector.broadcast %cst_9 : f32 to vector<2x8x32xf32>
    %c10 = arith.constant 10 : index
    %c0_10 = arith.constant 0 : index
    %c0_11 = arith.constant 0 : index
    %12 = vector.load %arg8[%c10, %c0_10, %c0_11] : memref<12x8x32xf32, #tpu.memory_space<vmem>>, vector<2x8x32xf32>
    tpu.vector_store %arg8[%c10, %c0_10, %c0_11], %11 {strides = array<i32>} : memref<12x8x32xf32, #tpu.memory_space<vmem>>, vector<2x8x32xf32>,
    %13 = vector.shape_cast %8 : vector<64x32xf32> to vector<8x8x32xf32>
    %c2 = arith.constant 2 : index
    %c0_12 = arith.constant 0 : index
    %c0_13 = arith.constant 0 : index
    %14 = vector.load %arg8[%c2, %c0_12, %c0_13] : memref<12x8x32xf32, #tpu.memory_space<vmem>>, vector<8x8x32xf32>
    tpu.vector_store %arg8[%c2, %c0_12, %c0_13], %13 {strides = array<i32>} : memref<12x8x32xf32, #tpu.memory_space<vmem>>, vector<8x8x32xf32>,
    %c0_14 = arith.constant 0 : index
    %c0_15 = arith.constant 0 : index
    %c0_16 = arith.constant 0 : index
    %15 = vector.load %arg8[%c0_14, %c0_15, %c0_16] : memref<12x8x32xf32, #tpu.memory_space<vmem>>, vector<8x8x32xf32>
    %c0_17 = arith.constant 0 : index
    %c0_18 = arith.constant 0 : index
    %c0_19 = arith.constant 0 : index
    %16 = vector.load %arg9[%c0_17, %c0_18, %c0_19] : memref<8x8x160xf32, #tpu.memory_space<vmem>>, vector<8x8x32xf32>
    tpu.vector_store %arg9[%c0_17, %c0_18, %c0_19], %15 {strides = array<i32>} : memref<8x8x160xf32, #tpu.memory_space<vmem>>, vector<8x8x32xf32>,
    %c1 = arith.constant 1 : index
    %c0_20 = arith.constant 0 : index
    %c0_21 = arith.constant 0 : index
    %17 = vector.load %arg8[%c1, %c0_20, %c0_21] : memref<12x8x32xf32, #tpu.memory_space<vmem>>, vector<8x8x32xf32>
    %c0_22 = arith.constant 0 : index
    %c0_23 = arith.constant 0 : index
    %c32 = arith.constant 32 : index
    %18 = vector.load %arg9[%c0_22, %c0_23, %c32] : memref<8x8x160xf32, #tpu.memory_space<vmem>>, vector<8x8x32xf32>
    tpu.vector_store %arg9[%c0_22, %c0_23, %c32], %17 {strides = array<i32>} : memref<8x8x160xf32, #tpu.memory_space<vmem>>, vector<8x8x32xf32>,
    %c2_24 = arith.constant 2 : index
    %c0_25 = arith.constant 0 : index
    %c0_26 = arith.constant 0 : index
    %19 = vector.load %arg8[%c2_24, %c0_25, %c0_26] : memref<12x8x32xf32, #tpu.memory_space<vmem>>, vector<8x8x32xf32>
    %c0_27 = arith.constant 0 : index
    %c0_28 = arith.constant 0 : index
    %c64 = arith.constant 64 : index
    %20 = vector.load %arg9[%c0_27, %c0_28, %c64] : memref<8x8x160xf32, #tpu.memory_space<vmem>>, vector<8x8x32xf32>
    tpu.vector_store %arg9[%c0_27, %c0_28, %c64], %19 {strides = array<i32>} : memref<8x8x160xf32, #tpu.memory_space<vmem>>, vector<8x8x32xf32>,
    %c3 = arith.constant 3 : index
    %c0_29 = arith.constant 0 : index
    %c0_30 = arith.constant 0 : index
    %21 = vector.load %arg8[%c3, %c0_29, %c0_30] : memref<12x8x32xf32, #tpu.memory_space<vmem>>, vector<8x8x32xf32>
    %c0_31 = arith.constant 0 : index
    %c0_32 = arith.constant 0 : index
    %c96 = arith.constant 96 : index
    %22 = vector.load %arg9[%c0_31, %c0_32, %c96] : memref<8x8x160xf32, #tpu.memory_space<vmem>>, vector<8x8x32xf32>
    tpu.vector_store %arg9[%c0_31, %c0_32, %c96], %21 {strides = array<i32>} : memref<8x8x160xf32, #tpu.memory_space<vmem>>, vector<8x8x32xf32>,
    %c4 = arith.constant 4 : index
    %c0_33 = arith.constant 0 : index
    %c0_34 = arith.constant 0 : index
    %23 = vector.load %arg8[%c4, %c0_33, %c0_34] : memref<12x8x32xf32, #tpu.memory_space<vmem>>, vector<8x8x32xf32>
    %c0_35 = arith.constant 0 : index
    %c0_36 = arith.constant 0 : index
    %c128 = arith.constant 128 : index
    %24 = vector.load %arg9[%c0_35, %c0_36, %c128] : memref<8x8x160xf32, #tpu.memory_space<vmem>>, vector<8x8x32xf32>
    tpu.vector_store %arg9[%c0_35, %c0_36, %c128], %23 {strides = array<i32>} : memref<8x8x160xf32, #tpu.memory_space<vmem>>, vector<8x8x32xf32>,
    %c0_37 = arith.constant 0 : index
    %c0_38 = arith.constant 0 : index
    %c0_39 = arith.constant 0 : index
    %25 = vector.load %arg9[%c0_37, %c0_38, %c0_39] : memref<8x8x160xf32, #tpu.memory_space<vmem>>, vector<8x8x160xf32>
    %26 = vector.shape_cast %25 : vector<8x8x160xf32> to vector<64x160xf32>
    %c0_40 = arith.constant 0 : index
    %c0_41 = arith.constant 0 : index
    %27 = vector.load %arg3[%c0_40, %c0_41] : memref<160x64xf32, #tpu.memory_space<vmem>>, vector<160x64xf32>
    %cst_42 = arith.constant dense<0.000000e+00> : vector<64x64xf32>
    %28 = tpu.matmul %26, %27, %cst_42 {dimension_numbers = #tpu.dot_dimension_numbers<[1], [0], [0], [1], [0, 0, 1, 1], [], []>} : vector<64x160xf32>, vector<160x64xf32>, vector<64x64xf32> -> vector<64x64xf32>
    %c0_43 = arith.constant 0 : index
    %c0_44 = arith.constant 0 : index
    %29 = vector.load %arg4[%c0_43, %c0_44] : memref<1x64xf32, #tpu.memory_space<vmem>>, vector<1x64xf32>
    %30 = vector.broadcast %29 : vector<1x64xf32> to vector<64x64xf32>
    %31 = arith.addf %28, %30 : vector<64x64xf32>
    %cst_45 = arith.constant 0.000000e+00 : f32
    %32 = vector.broadcast %cst_45 : f32 to vector<64x64xf32>
    %33 = arith.maximumf %31, %32 : vector<64x64xf32>
    %cst_46 = arith.constant 0.000000e+00 : f32
    %34 = vector.broadcast %cst_46 : f32 to vector<1x8x64xf32>
    %c0_47 = arith.constant 0 : index
    %c0_48 = arith.constant 0 : index
    %c0_49 = arith.constant 0 : index
    %35 = vector.load %arg10[%c0_47, %c0_48, %c0_49] : memref<10x8x64xf32, #tpu.memory_space<vmem>>, vector<1x8x64xf32>
    tpu.vector_store %arg10[%c0_47, %c0_48, %c0_49], %34 {strides = array<i32>} : memref<10x8x64xf32, #tpu.memory_space<vmem>>, vector<1x8x64xf32>,
    %cst_50 = arith.constant 0.000000e+00 : f32
    %36 = vector.broadcast %cst_50 : f32 to vector<1x8x64xf32>
    %c9 = arith.constant 9 : index
    %c0_51 = arith.constant 0 : index
    %c0_52 = arith.constant 0 : index
    %37 = vector.load %arg10[%c9, %c0_51, %c0_52] : memref<10x8x64xf32, #tpu.memory_space<vmem>>, vector<1x8x64xf32>
    tpu.vector_store %arg10[%c9, %c0_51, %c0_52], %36 {strides = array<i32>} : memref<10x8x64xf32, #tpu.memory_space<vmem>>, vector<1x8x64xf32>,
    %38 = vector.shape_cast %33 : vector<64x64xf32> to vector<8x8x64xf32>
    %c1_53 = arith.constant 1 : index
    %c0_54 = arith.constant 0 : index
    %c0_55 = arith.constant 0 : index
    %39 = vector.load %arg10[%c1_53, %c0_54, %c0_55] : memref<10x8x64xf32, #tpu.memory_space<vmem>>, vector<8x8x64xf32>
    tpu.vector_store %arg10[%c1_53, %c0_54, %c0_55], %38 {strides = array<i32>} : memref<10x8x64xf32, #tpu.memory_space<vmem>>, vector<8x8x64xf32>,
    %c0_56 = arith.constant 0 : index
    %c0_57 = arith.constant 0 : index
    %c0_58 = arith.constant 0 : index
    %40 = vector.load %arg10[%c0_56, %c0_57, %c0_58] : memref<10x8x64xf32, #tpu.memory_space<vmem>>, vector<8x8x64xf32>
    %c1_59 = arith.constant 1 : index
    %c0_60 = arith.constant 0 : index
    %c0_61 = arith.constant 0 : index
    %41 = vector.load %arg10[%c1_59, %c0_60, %c0_61] : memref<10x8x64xf32, #tpu.memory_space<vmem>>, vector<8x8x64xf32>
    %c2_62 = arith.constant 2 : index
    %c0_63 = arith.constant 0 : index
    %c0_64 = arith.constant 0 : index
    %42 = vector.load %arg10[%c2_62, %c0_63, %c0_64] : memref<10x8x64xf32, #tpu.memory_space<vmem>>, vector<8x8x64xf32>
    %c0_65 = arith.constant 0 : index
    %c0_66 = arith.constant 0 : index
    %43 = vector.load %arg5[%c0_65, %c0_66] : memref<6x64xf32, #tpu.memory_space<vmem>>, vector<1x64xf32>
    %44 = vector.shape_cast %43 : vector<1x64xf32> to vector<1x1x64xf32>
    %45 = vector.broadcast %44 : vector<1x1x64xf32> to vector<8x8x64xf32>
    %46 = arith.mulf %40, %45 : vector<8x8x64xf32>
    %c1_67 = arith.constant 1 : index
    %c0_68 = arith.constant 0 : index
    %47 = vector.load %arg5[%c1_67, %c0_68] : memref<6x64xf32, #tpu.memory_space<vmem>>, vector<1x64xf32>
    %48 = vector.shape_cast %47 : vector<1x64xf32> to vector<1x1x64xf32>
    %49 = vector.broadcast %48 : vector<1x1x64xf32> to vector<8x8x64xf32>
    %50 = arith.mulf %41, %49 : vector<8x8x64xf32>
    %51 = arith.addf %46, %50 : vector<8x8x64xf32>
    %c2_69 = arith.constant 2 : index
    %c0_70 = arith.constant 0 : index
    %52 = vector.load %arg5[%c2_69, %c0_70] : memref<6x64xf32, #tpu.memory_space<vmem>>, vector<1x64xf32>
    %53 = vector.shape_cast %52 : vector<1x64xf32> to vector<1x1x64xf32>
    %54 = vector.broadcast %53 : vector<1x1x64xf32> to vector<8x8x64xf32>
    %55 = arith.mulf %42, %54 : vector<8x8x64xf32>
    %56 = arith.addf %51, %55 : vector<8x8x64xf32>
    %cst_71 = arith.constant dense<0.000000e+00> : vector<8x8xf32>
    %57 = vector.multi_reduction <add>, %56, %cst_71 [2] : vector<8x8x64xf32> to vector<8x8xf32>
    %c0_72 = arith.constant 0 : index
    %c0_73 = arith.constant 0 : index
    %58 = vector.load %arg6[%c0_72, %c0_73] : memref<1x1xf32, #tpu.memory_space<vmem>>, vector<1x1xf32>
    %59 = vector.broadcast %58 : vector<1x1xf32> to vector<8x8xf32>
    %60 = arith.addf %57, %59 : vector<8x8xf32>
    %c3_74 = arith.constant 3 : index
    %c0_75 = arith.constant 0 : index
    %61 = vector.load %arg5[%c3_74, %c0_75] : memref<6x64xf32, #tpu.memory_space<vmem>>, vector<1x64xf32>
    %62 = vector.shape_cast %61 : vector<1x64xf32> to vector<1x1x64xf32>
    %63 = vector.broadcast %62 : vector<1x1x64xf32> to vector<8x8x64xf32>
    %64 = arith.mulf %40, %63 : vector<8x8x64xf32>
    %c4_76 = arith.constant 4 : index
    %c0_77 = arith.constant 0 : index
    %65 = vector.load %arg5[%c4_76, %c0_77] : memref<6x64xf32, #tpu.memory_space<vmem>>, vector<1x64xf32>
    %66 = vector.shape_cast %65 : vector<1x64xf32> to vector<1x1x64xf32>
    %67 = vector.broadcast %66 : vector<1x1x64xf32> to vector<8x8x64xf32>
    %68 = arith.mulf %41, %67 : vector<8x8x64xf32>
    %69 = arith.addf %64, %68 : vector<8x8x64xf32>
    %c5 = arith.constant 5 : index
    %c0_78 = arith.constant 0 : index
    %70 = vector.load %arg5[%c5, %c0_78] : memref<6x64xf32, #tpu.memory_space<vmem>>, vector<1x64xf32>
    %71 = vector.shape_cast %70 : vector<1x64xf32> to vector<1x1x64xf32>
    %72 = vector.broadcast %71 : vector<1x1x64xf32> to vector<8x8x64xf32>
    %73 = arith.mulf %42, %72 : vector<8x8x64xf32>
    %74 = arith.addf %69, %73 : vector<8x8x64xf32>
    %cst_79 = arith.constant dense<0.000000e+00> : vector<8x8xf32>
    %75 = vector.multi_reduction <add>, %74, %cst_79 [2] : vector<8x8x64xf32> to vector<8x8xf32>
    %c0_80 = arith.constant 0 : index
    %c0_81 = arith.constant 0 : index
    %76 = vector.load %arg6[%c0_80, %c0_81] : memref<1x1xf32, #tpu.memory_space<vmem>>, vector<1x1xf32>
    %77 = vector.broadcast %76 : vector<1x1xf32> to vector<8x8xf32>
    %78 = arith.addf %75, %77 : vector<8x8xf32>
    %79 = tpu.transpose %60, [1, 0] : vector<8x8xf32> -> vector<8x8xf32>
    %c0_82 = arith.constant 0 : index
    %c0_83 = arith.constant 0 : index
    %c0_84 = arith.constant 0 : index
    %80 = vector.load %arg7[%c0_82, %c0_83, %c0_84] : memref<2x8x8xf32, #tpu.memory_space<vmem>>, vector<1x8x8xf32>
    %81 = vector.shape_cast %80 : vector<1x8x8xf32> to vector<8x8xf32>
    %82 = vector.shape_cast %79 : vector<8x8xf32> to vector<1x8x8xf32>
    tpu.vector_store %arg7[%c0_82, %c0_83, %c0_84], %82 {strides = array<i32>} : memref<2x8x8xf32, #tpu.memory_space<vmem>>, vector<1x8x8xf32>,
    %83 = tpu.transpose %78, [1, 0] : vector<8x8xf32> -> vector<8x8xf32>
    %c1_85 = arith.constant 1 : index
    %c0_86 = arith.constant 0 : index
    %c0_87 = arith.constant 0 : index
    %84 = vector.load %arg7[%c1_85, %c0_86, %c0_87] : memref<2x8x8xf32, #tpu.memory_space<vmem>>, vector<1x8x8xf32>
    %85 = vector.shape_cast %84 : vector<1x8x8xf32> to vector<8x8xf32>
    %86 = vector.shape_cast %83 : vector<8x8xf32> to vector<1x8x8xf32>
    tpu.vector_store %arg7[%c1_85, %c0_86, %c0_87], %86 {strides = array<i32>} : memref<2x8x8xf32, #tpu.memory_space<vmem>>, vector<1x8x8xf32>,
    return
  }
  func.func @transform_0(%arg0: i32) -> (i32, i32, i32) {
    %c0_i32 = arith.constant 0 : i32
    %c0_i32_0 = arith.constant 0 : i32
    %c0_i32_1 = arith.constant 0 : i32
    return %c0_i32, %arg0, %c0_i32_0 : i32, i32, i32
  }
  func.func @transform_1(%arg0: i32) -> (i32, i32) {
    %c0_i32 = arith.constant 0 : i32
    %c0_i32_0 = arith.constant 0 : i32
    %c0_i32_1 = arith.constant 0 : i32
    return %c0_i32, %c0_i32_0 : i32, i32
  }
  func.func @transform_2(%arg0: i32) -> (i32, i32) {
    %c0_i32 = arith.constant 0 : i32
    %c0_i32_0 = arith.constant 0 : i32
    %c0_i32_1 = arith.constant 0 : i32
    return %c0_i32, %c0_i32_0 : i32, i32
  }
  func.func @transform_3(%arg0: i32) -> (i32, i32) {
    %c0_i32 = arith.constant 0 : i32
    %c0_i32_0 = arith.constant 0 : i32
    %c0_i32_1 = arith.constant 0 : i32
    return %c0_i32, %c0_i32_0 : i32, i32
  }
  func.func @transform_4(%arg0: i32) -> (i32, i32) {
    %c0_i32 = arith.constant 0 : i32
    %c0_i32_0 = arith.constant 0 : i32
    %c0_i32_1 = arith.constant 0 : i32
    return %c0_i32, %c0_i32_0 : i32, i32
  }
  func.func @transform_5(%arg0: i32) -> (i32, i32) {
    %c0_i32 = arith.constant 0 : i32
    %c0_i32_0 = arith.constant 0 : i32
    %c0_i32_1 = arith.constant 0 : i32
    return %c0_i32, %c0_i32_0 : i32, i32
  }
  func.func @transform_6(%arg0: i32) -> (i32, i32, i32) {
    %c0_i32 = arith.constant 0 : i32
    %c0_i32_0 = arith.constant 0 : i32
    %c0_i32_1 = arith.constant 0 : i32
    return %c0_i32, %arg0, %c0_i32_0 : i32, i32, i32
  }
}

</mosaic_0001>

<bundles_post_ra>
// kernel: tpu_custom_call.1
= control target key start
LH: loop header
LB: loop body
LE: loop exit
PB: predicated region body
PF: predicated region fallthrough
CT: control target
= control target key end

     0   :  { %s2026_s0 = inlined_call_operand.vmem [shape: f32[8,16,8], index: 0, kind: input, shape index: {}]   ;;  %s2027_s1 = inlined_call_operand.vmem [shape: f32[8,64], index: 1, kind: input, shape index: {}]   ;;  %s2028_s2 = inlined_call_operand.vmem [shape: f32[160,64], index: 2, kind: input, shape index: {}]   ;;  %s2029_s3 = inlined_call_operand.vmem [shape: f32[1,64], index: 3, kind: input, shape index: {}]   ;;  %s2030_s4 = inlined_call_operand.vmem [shape: f32[6,64], index: 4, kind: input, shape index: {}]   ;;  %s2031_s5 = inlined_call_operand.<no memory space> [shape: f32[1,1], index: 5, kind: input, shape index: {}]   ;;  %s2032_s6 = inlined_call_operand.vmem [shape: f32[2,16,8], index: 6, kind: output, shape index: {}]  }
   0x1   :  { %v11_v0 = vstv %s2031_s5 }
   0x2   :  { %12 = vst [vmem:[#allocation5] sm:$0x1] %v11_v0 }
   0x3   :  { %s1570_s23 = smov 0   ;;  %s1572_s24 = smov 0  }
   0x4   :  { %s1574_s25 = smov 0  }
   0x5 LB: > { %s1371_s5 = sadd.s32 4294967295, %s1525_s25   ;;  %s1587_s26 = sadd.s32 1, %s1525_s25   ;;  %s1525_s25 = sphi %s1574_s25, %s2036_s25   ;;  %s1521_s24 = sphi %s1572_s24, %s2035_s24   ;;  %s1517_s23 = sphi %s1570_s23, %s2034_s23  }
   0x6   : > { %s22_s27 = ssub.s32 %s1525_s25, %s1587_s26  ;;  %s25_s28 = sadd.s32 1, %s1521_s24 }
   0x7   : > { %p23_p0 = scmp.eq.s32.totalorder %s22_s27, 0  ;;  %p32_p1 = scmp.ne.s32.totalorder %s1521_s24, %s1517_s23 }
   0x8   : > { %p33_p2 = scmp.eq.s32.totalorder %s1525_s25, 0  ;;  %p167_p3 = scmp.eq.s32.totalorder %s1371_s5, 1 }
   0x9   : > { %s1598_s29 = scalar_select %p23_p0, %s1521_s24, %s25_s28  }
   0xa   : > { %p34_p4 = por %p33_p2, %p32_p1  ;;  %p1600_p5 = por %p167_p3, %p32_p1 }
   0xb   : > { %p1374_p6 = scmp.ge.s32.totalorder %s1525_s25, 2 }
   0xd   : > { %204 = sbr.rel (%p1374_p6) target bundleno = 26 (0x1a), region = 36 }
  0x12   : > { %207 = sbr.rel (!%p34_p4) target bundleno = 26 (0x1a), region = 40  ;;  %s209_s7 = sand.u32 (%p34_p4), 1, %s1521_s24  }
  0x13   : > { %s1376_s8 = sshll.u32 (%p34_p4), %s1525_s25, 3  ;;  %s1375_s9 = sshll.u32 (%p34_p4), %s209_s7, 6 }
  0x14   : > { %s213_s12 = scalar_lea.vmem (%p34_p4), %s2026_s0, %s1376_s8  ;;  %s211_s13 = scalar_lea.vmem (%p34_p4), [#allocation6], %s1375_s9 }
  0x15   : > { %v256_v1 = vld [vmem:[%s213_s12] sm:$0xff] (%p34_p4)  ;;  %v258_v2 = vld [vmem:[%s213_s12 + $0x10] sm:$0xff] (%p34_p4) }
  0x16   : > { %v260_v3 = vld [vmem:[%s213_s12 + $0x20] sm:$0xff] (%p34_p4)  ;;  %257 = vst [vmem:[%s211_s13] sm:$0xff] (%p34_p4), %v256_v1  ;;  %259 = vst [vmem:[%s211_s13 + $0x8] sm:$0xff] (%p34_p4), %v258_v2  ;;  %v262_v4 = vld [vmem:[%s213_s12 + $0x30] sm:$0xff] (%p34_p4) }
  0x17   : > { %261 = vst [vmem:[%s211_s13 + $0x10] sm:$0xff] %v260_v3  ;;  %v264_v5 = vld [vmem:[%s213_s12 + $0x40] sm:$0xff]  ;;  %v266_v6 = vld [vmem:[%s213_s12 + $0x50] sm:$0xff]  ;;  %263 = vst [vmem:[%s211_s13 + $0x18] sm:$0xff] %v262_v4 }
  0x18   : > { %265 = vst [vmem:[%s211_s13 + $0x20] sm:$0xff] %v264_v5  ;;  %267 = vst [vmem:[%s211_s13 + $0x28] sm:$0xff] %v266_v6  ;;  %v268_v7 = vld [vmem:[%s213_s12 + $0x60] sm:$0xff]  ;;  %v270_v8 = vld [vmem:[%s213_s12 + $0x70] sm:$0xff] }
  0x19   : > { %269 = vst [vmem:[%s211_s13 + $0x30] sm:$0xff] %v268_v7  ;;  %271 = vst [vmem:[%s211_s13 + $0x38] sm:$0xff] %v270_v8 }
  0x1a PF: > { %p1377_p7 = scmp.ge.s32.totalorder %s1525_s25, 1  ;;  %p276_p8 = scmp.lt.s32.totalorder %s1525_s25, 3 }
  0x1c   : > { %p277_p9 = pnand %p1377_p7, %p276_p8 }
  0x1d   : > { %s283_s16 = sand.u32 (!%p277_p9), 1, %s1517_s23   ;;  %s1528_s19 = smov (!%p277_p9), 96  }
  0x1e   : > { %280 = sbr.rel (%p277_p9) target bundleno = 1053 (0x41d), region = 78  ;;  %s1378_s17 = sshll.u32 (!%p277_p9), %s283_s16, 6 }
  0x1f   : > { %s285_s18 = scalar_lea.vmem (!%p277_p9), [#allocation6], %s1378_s17  ;;  %s1529_s20 = smov (!%p277_p9), 32  }
  0x20   : > { %s1530_s9 = smov (!%p277_p9), 64   ;;  %s1379_s11 = sshll.u32 (!%p277_p9), %s283_s16, 4 }
  0x21   : > { %s310_s12 = scalar_lea.vmem (!%p277_p9), [#allocation7], %s1379_s11 }
  0x23   : > { %v319_v9 = vld [vmem:[%s2027_s1] sm:$0xff]  ;;  %vm320_vm0 = vcmask 64512   ;;  %v311_v10 = vld [vmem:[%s285_s18] sm:$0xff]  ;;  %v314_v13 = vld [vmem:[%s285_s18 + $0x18] sm:$0xff]  ;;  %vm498_vm1 = vcmask 261120   ;;  %v1527_v20 = vmov 0.0  }
  0x24   : > { %1418 = vmatprep.subr.mxu0 %v319_v9  ;;  %v312_v11 = vld [vmem:[%s285_s18 + $0x8] sm:$0xff]  ;;  %v313_v12 = vld [vmem:[%s285_s18 + $0x10] sm:$0xff]  ;;  %1420 = vmatprep.mubr.msk.f32.mxu0 %vm320_vm0, %v311_v10  ;;  %v315_v14 = vld [vmem:[%s285_s18 + $0x20] sm:$0xff]  ;;  %500 = vst.msk [vmem:[#allocation2 + $0x8] sm:$0xff] %vm498_vm1, %v1527_v20  ;;  %vm570_vm2 = vcmask 523520   ;;  %vm619_vm3 = vcmask 785920  }
  0x25   : > { %1419 = vmatpush3.msra.mxu0 %v319_v9  ;;  %v316_v15 = vld [vmem:[%s285_s18 + $0x28] sm:$0xff]  ;;  %v317_v16 = vld [vmem:[%s285_s18 + $0x30] sm:$0xff]  ;;  %v318_v17 = vld [vmem:[%s285_s18 + $0x38] sm:$0xff]  ;;  %499 = vst.msk [vmem:[#allocation2] sm:$0xff] %vm498_vm1, %v1527_v20  ;;  %1432 = vmatprep.subr.mxu1 %v1527_v20  ;;  %vm669_vm4 = vcmask 1048320   ;;  %vm875_vm5 = vcmask 523264  }
  0x26   : > { %1421 = vmatmul.mubr.msk.f32.vlgmr.msra.gmra.mxu0 %vm320_vm0, %v312_v11  ;;  %502 = vst.msk [vmem:[#allocation2 + $0x50] sm:$0xff] %vm498_vm1, %v1527_v20  ;;  %503 = vst.msk [vmem:[#allocation2 + $0x58] sm:$0xff] %vm498_vm1, %v1527_v20  ;;  %762 = vmatprep.subr.mxu0 %v1527_v20  ;;  %v726_v29 = vld [vmem:[%s2028_s2 + $0x78] sm:$0xff]  ;;  %v725_v30 = vld [vmem:[%s2028_s2 + $0x70] sm:$0xff]  ;;  %vm1139_vm6 = vcmask 1041409   ;;  %vm1141_vm7 = vcmask 1042434  }
  0x27   : > { %1423 = vmatprep.mubr.msk.f32.mxu0 %vm320_vm0, %v313_v12  ;;  %763 = vmatpush1.msra.mxu0 %v726_v29  ;;  %v724_v31 = vld [vmem:[%s2028_s2 + $0x68] sm:$0xff]  ;;  %v723_v33 = vld [vmem:[%s2028_s2 + $0x60] sm:$0xff]  ;;  %v722_v34 = vld [vmem:[%s2028_s2 + $0x58] sm:$0xff]  ;;  %876 = vst.msk [vmem:[#allocation4] sm:$0xff] %vm875_vm5, %v1527_v20  ;;  %vm1143_vm8 = vcmask 1043459   ;;  %vm1145_vm9 = vcmask 1044484  }
  0x28   : > { %1452 = vmatpush1.msra.mxu1 %v726_v29  ;;  %764 = vmatprep.subr.mxu0 %v1527_v20  ;;  %v721_v35 = vld [vmem:[%s2028_s2 + $0x50] sm:$0xff]  ;;  %v720_v36 = vld [vmem:[%s2028_s2 + $0x48] sm:$0xff]  ;;  %v719_v45 = vld [vmem:[%s2028_s2 + $0x40] sm:$0xff]  ;;  %878 = vst.msk [vmem:[#allocation4 + $0x48] sm:$0xff] %vm875_vm5, %v1527_v20  ;;  %vm1147_vm10 = vcmask 1045509   ;;  %vm1149_vm11 = vcmask 1046534  }
  0x29   : > { %1433 = vmatprep.subr.mxu1 %v1527_v20  ;;  %765 = vmatpush1.msra.mxu0 %v725_v30  ;;  %v718_v46 = vld [vmem:[%s2028_s2 + $0x38] sm:$0xff]  ;;  %v717_v54 = vld [vmem:[%s2028_s2 + $0x30] sm:$0xff]  ;;  %v716_v57 = vld [vmem:[%s2028_s2 + $0x28] sm:$0xff]  ;;  %vm1151_vm12 = vcmask 1047559   ;;  %s1406_s13 = sshll.u32 (%p1600_p5), %s1371_s5, 3 }
  0x2a   : > { %1424 = vmatmul.mubr.msk.f32.gmra.mxu0 %vm320_vm0, %v314_v13  ;;  %1453 = vmatpush1.msra.mxu1 %v725_v30  ;;  %v715_v63 = vld [vmem:[%s2028_s2 + $0x20] sm:$0xff]  ;;  %v714_v0 = vld [vmem:[%s2028_s2 + $0x18] sm:$0xff]  ;;  %v713_v8 = vld [vmem:[%s2028_s2 + $0x10] sm:$0xff]  ;;  %s1277_s23 = scalar_lea.vmem (%p1600_p5), %s2032_s6, %s1406_s13 }
  0x2b   : > { %1426 = vmatprep.mubr.msk.f32.mxu0 %vm320_vm0, %v315_v14  ;;  %v530_v24 = vld [vmem:[#allocation2 + $0x8] sm:$0xff]  ;;  %766 = vmatprep.subr.mxu0 %v1527_v20  ;;  %v711_v13 = vld [vmem:[%s2028_s2] sm:$0xff]  ;;  %v730_v14 = vld [vmem:[%s2028_s2 + $0x98] sm:$0xff] }
  0x2c   : > { %522 = vst.msk [vmem:[#allocation3 + $0x10] sm:$0xff] %vm498_vm1, %v530_v24  ;;  %v513_v32 = vld [vmem:[#allocation2] sm:$0xff]  ;;  %1434 = vmatprep.subr.mxu1 %v1527_v20  ;;  %767 = vmatpush1.msra.mxu0 %v724_v31  ;;  %v712_v9 = vld [vmem:[%s2028_s2 + $0x8] sm:$0xff] }
  0x2d   : > { %v1667_v28 = vld [vmem:[#allocation2 + $0x50] sm:$0xff]  ;;  %521 = vst.msk [vmem:[#allocation3] sm:$0xff] %vm498_vm1, %v513_v32  ;;  %1454 = vmatpush1.msra.mxu1 %v724_v31  ;;  %768 = vmatprep.subr.mxu0 %v1527_v20 }
  0x2e   : > { %1427 = vmatmul.mubr.msk.f32.gmra.mxu0 %vm320_vm0, %v316_v15  ;;  %693 = vst.msk [vmem:[#allocation3 + $0x68] sm:$0xff] %vm498_vm1, %v1667_v28  ;;  %1435 = vmatprep.subr.mxu1 %v1527_v20 }
  0x2f   : > { %1429 = vmatprep.mubr.msk.f32.mxu0 %vm320_vm0, %v317_v16  ;;  %769 = vmatpush1.msra.mxu0 %v723_v33 }
  0x30   : > { %1455 = vmatpush1.msra.mxu1 %v723_v33  ;;  %770 = vmatprep.subr.mxu0 %v1527_v20 }
  0x31   : > { %1436 = vmatprep.subr.mxu1 %v1527_v20  ;;  %771 = vmatpush1.msra.mxu0 %v722_v34 }
  0x32   : > { %1430 = vmatmul.mubr.msk.f32.gmra.mxu0 %vm320_vm0, %v318_v17  ;;  %1456 = vmatpush1.msra.mxu1 %v722_v34  ;;  %v729_v17 = vld [vmem:[%s2028_s2 + $0x90] sm:$0xff] }
  0x33   : > { %772 = vmatprep.subr.mxu0 %v1527_v20  ;;  %1437 = vmatprep.subr.mxu1 %v1527_v20 }
  0x34   : > { %773 = vmatpush1.msra.mxu0 %v721_v35  ;;  %1457 = vmatpush1.msra.mxu1 %v721_v35 }
  0x35   : > { %774 = vmatprep.subr.mxu0 %v1527_v20  ;;  %1438 = vmatprep.subr.mxu1 %v1527_v20 }
  0x36   : > { %775 = vmatpush1.msra.mxu0 %v720_v36  ;;  %1458 = vmatpush1.msra.mxu1 %v720_v36 }
  0x37   : > { %776 = vmatprep.subr.mxu0 %v1527_v20  ;;  %1439 = vmatprep.subr.mxu1 %v1527_v20 }
  0x38   : > { %777 = vmatpush1.msra.mxu0 %v719_v45  ;;  %1459 = vmatpush1.msra.mxu1 %v719_v45 }
  0x39   : > { %778 = vmatprep.subr.mxu0 %v1527_v20  ;;  %1440 = vmatprep.subr.mxu1 %v1527_v20 }
  0x3a   : > { %779 = vmatpush1.msra.mxu0 %v718_v46  ;;  %1460 = vmatpush1.msra.mxu1 %v718_v46 }
  0x3b   : > { %780 = vmatprep.subr.mxu0 %v1527_v20  ;;  %1441 = vmatprep.subr.mxu1 %v1527_v20 }
  0x3c   : > { %781 = vmatpush1.msra.mxu0 %v717_v54  ;;  %1461 = vmatpush1.msra.mxu1 %v717_v54 }
  0x3d   : > { %782 = vmatprep.subr.mxu0 %v1527_v20  ;;  %1442 = vmatprep.subr.mxu1 %v1527_v20 }
  0x3e   : > { %783 = vmatpush1.msra.mxu0 %v716_v57  ;;  %1462 = vmatpush1.msra.mxu1 %v716_v57 }
  0x3f   : > { %784 = vmatprep.subr.mxu0 %v1527_v20  ;;  %1443 = vmatprep.subr.mxu1 %v1527_v20 }
  0x40   : > { %785 = vmatpush1.msra.mxu0 %v715_v63  ;;  %1463 = vmatpush1.msra.mxu1 %v715_v63 }
  0x41   : > { %786 = vmatprep.subr.mxu0 %v1527_v20  ;;  %1444 = vmatprep.subr.mxu1 %v1527_v20 }
  0x42   : > { %787 = vmatpush1.msra.mxu0 %v714_v0  ;;  %1464 = vmatpush1.msra.mxu1 %v714_v0 }
  0x43   : > { %788 = vmatprep.subr.mxu0 %v1527_v20  ;;  %1445 = vmatprep.subr.mxu1 %v1527_v20 }
  0x44   : > { %789 = vmatpush1.msra.mxu0 %v713_v8  ;;  %1465 = vmatpush1.msra.mxu1 %v713_v8 }
  0x45   : > { %790 = vmatprep.subr.mxu0 %v1527_v20  ;;  %1446 = vmatprep.subr.mxu1 %v1527_v20 }
  0x46   : > { %791 = vmatpush1.msra.mxu0 %v712_v9  ;;  %1466 = vmatpush1.msra.mxu1 %v712_v9 }
  0x47   : > { %792 = vmatprep.subr.mxu0 %v1527_v20  ;;  %1447 = vmatprep.subr.mxu1 %v1527_v20 }
  0x48   : > { %793 = vmatpush1.msra.mxu0 %v711_v13  ;;  %1467 = vmatpush1.msra.mxu1 %v711_v13  ;;  %v888_v13 = vld [vmem:[#allocation4] sm:$0xff] }
  0x49   : > { %818 = vmatprep.subr.mxu0 %v1527_v20  ;;  %1448 = vmatprep.subr.mxu1 %v1527_v20 }
  0x4a   : > { %819 = vmatpush2.msra.mxu0 %v730_v14  ;;  %1468 = vmatpush2.msra.mxu1 %v730_v14 }
  0x4b   : > { %820 = vmatprep.subr.mxu0 %v1527_v20  ;;  %1449 = vmatprep.subr.mxu1 %v1527_v20 }
  0x4c   : > { %821 = vmatpush2.msra.mxu0 %v729_v17  ;;  %1469 = vmatpush2.msra.mxu1 %v729_v17  ;;  %v1895_v17 = vld [vmem:[%s2030_s4] ss:$0 sm:$0xff] }
  0x4d   : > { %822 = vmatprep.subr.mxu0 %v1527_v20  ;;  %1450 = vmatprep.subr.mxu1 %v1527_v20 }
  0xe6   : > { %v1626_v18 = vpop.f32.mrf.mxu0 }
  0xe8   : > { %v1628_v19 = vpop.f32.mrf.mxu0 }
  0xe9   : > { %458 = vrot.lane.b32.xlu1 %v1628_v19, %s1528_s19 }
  0xea   : > { %v1642_v21 = vpop.f32.mrf.mxu0 }
  0xec   : > { %v421_v22 = vpop.f32.mrf.mxu0 }
  0xed   : > { %462 = vrot.lane.b32.xlu0 %v421_v22, %s1528_s19 }
  0xee   : > { %v1645_v23 = vpop.f32.mrf.mxu0 }
  0xf0   : > { %v1647_v25 = vpop.f32.mrf.mxu0 }
  0xf1   : > { %464 = vrot.lane.b32.xlu0 %v1642_v21, %s1528_s19  ;;  %466 = vrot.lane.b32.xlu1 %v1647_v25, %s1528_s19 }
  0xf2   : > { %v1654_v26 = vpop.f32.mrf.mxu0 }
  0xf4   : > { %v1660_v27 = vpop.f32.mrf.mxu0 }
  0xf5   : > { %460 = vrot.lane.b32.xlu0 %v1626_v18, %s1528_s19  ;;  %468 = vrot.lane.b32.xlu1 %v1645_v23, %s1528_s19 }
  0xf9   : > { %472 = vrot.lane.b32.xlu1 %v1654_v26, %s1528_s19  ;;  %470 = vrot.lane.b32.xlu0 %v1660_v27, %s1528_s19 }
  0xfd   : > { %546 = vrot.lane.b32.xlu1 %v530_v24, %s1529_s20 }
 0x15b   : > { %v459_v37 = vpop.permute.xlu1 %458 }
 0x15c   : > { %v482_v38 = vmax.f32 %v1628_v19, %v459_v37 }
 0x15e   : > { %v490_v39 = vmax.f32 %v482_v38, 0.0 }
 0x15f   : > { %v463_v40 = vpop.permute.xlu0 %462 }
 0x160   : > { %505 = vst.msk [vmem:[#allocation2 + $0x10] sm:$0xff] %vm498_vm1, %v490_v39  ;;  %v484_v41 = vmax.f32 %v421_v22, %v463_v40  ;;  %v686_v22 = vld [vmem:[#allocation2 + $0x58] sm:$0xff] }
 0x161   : > { %694 = vst.msk [vmem:[#allocation3 + $0x78] sm:$0xff] %vm498_vm1, %v686_v22 }
 0x162   : > { %v492_v42 = vmax.f32 %v484_v41, 0.0 }
 0x163   : > { %v465_v43 = vpop.permute.xlu0 %464  ;;  %v467_v44 = vpop.permute.xlu1 %466 }
 0x164   : > { %507 = vst.msk [vmem:[#allocation2 + $0x20] sm:$0xff] %vm498_vm1, %v492_v42  ;;  %v485_v47 = vmax.f32 %v1642_v21, %v465_v43  ;;  %v486_v48 = vmax.f32 %v1647_v25, %v467_v44  ;;  %v727_v21 = vld [vmem:[%s2028_s2 + $0x80] sm:$0xff] }
 0x166   : > { %v493_v49 = vmax.f32 %v485_v47, 0.0  ;;  %v494_v50 = vmax.f32 %v486_v48, 0.0 }
 0x167   : > { %v461_v51 = vpop.permute.xlu0 %460  ;;  %v469_v52 = vpop.permute.xlu1 %468  ;;  %v1720_v53 = vld [vmem:[#allocation2 + $0x10] sm:$0xff] }
 0x168   : > { %508 = vst.msk [vmem:[#allocation2 + $0x28] sm:$0xff] %vm498_vm1, %v493_v49  ;;  %509 = vst.msk [vmem:[#allocation2 + $0x30] sm:$0xff] %vm498_vm1, %v494_v50  ;;  %v483_v55 = vmax.f32 %v1626_v18, %v461_v51  ;;  %v487_v56 = vmax.f32 %v1645_v23, %v469_v52  ;;  %v728_v18 = vld [vmem:[%s2028_s2 + $0x88] sm:$0xff]  ;;  %v710_v57 = vld [vmem:[#allocation3 + $0x78] sm:$0xff] }
 0x169   : > { %523 = vst.msk [vmem:[#allocation3 + $0x20] sm:$0xff] %vm498_vm1, %v1720_v53  ;;  %823 = vmatpush2.msra.mxu0 %v728_v18  ;;  %1470 = vmatpush2.msra.mxu1 %v728_v18  ;;  %v1900_v18 = vld [vmem:[%s2030_s4 + $0x1] ss:$0 sm:$0xff] }
 0x16a   : > { %v491_v58 = vmax.f32 %v483_v55, 0.0  ;;  %v495_v59 = vmax.f32 %v487_v56, 0.0  ;;  %824 = vmatprep.subr.mxu0 %v1527_v20  ;;  %1451 = vmatprep.subr.mxu1 %v1527_v20 }
 0x16b   : > { %v1738_v60 = vld [vmem:[#allocation2 + $0x20] sm:$0xff]  ;;  %v473_v61 = vpop.permute.xlu1 %472  ;;  %v471_v62 = vpop.permute.xlu0 %470  ;;  %825 = vmatpush2.msra.mxu0 %v727_v21  ;;  %1471 = vmatpush2.msra.mxu1 %v727_v21 }
 0x16c   : > { %687 = vst.msk [vmem:[#allocation3 + $0x8] sm:$0xff] %vm498_vm1, %v1738_v60  ;;  %506 = vst.msk [vmem:[#allocation2 + $0x18] sm:$0xff] %vm498_vm1, %v491_v58  ;;  %v489_v1 = vmax.f32 %v1654_v26, %v473_v61  ;;  %v488_v2 = vmax.f32 %v1660_v27, %v471_v62  ;;  %v1388_v61 = vld [vmem:[%s2029_s3] ss:$0 sm:$0xff] }
 0x16d   : > { %510 = vst.msk [vmem:[#allocation2 + $0x38] sm:$0xff] %vm498_vm1, %v495_v59  ;;  %525 = vst.msk [vmem:[#allocation3 + $0x40] sm:$0xff] %vm498_vm1, %v1738_v60 }
 0x16e   : > { %v497_v3 = vmax.f32 %v489_v1, 0.0  ;;  %v496_v4 = vmax.f32 %v488_v2, 0.0 }
 0x16f   : > { %v1758_v5 = vld [vmem:[#allocation2 + $0x28] sm:$0xff]  ;;  %v1760_v6 = vld [vmem:[#allocation2 + $0x30] sm:$0xff]  ;;  %v547_v7 = vpop.permute.xlu1 %546 }
 0x170   : > { %688 = vst.msk [vmem:[#allocation3 + $0x18] sm:$0xff] %vm498_vm1, %v1758_v5  ;;  %689 = vst.msk [vmem:[#allocation3 + $0x28] sm:$0xff] %vm498_vm1, %v1760_v6  ;;  %554 = vrot.lane.b32.xlu0 %v1758_v5, %s1529_s20 }
 0x171   : > { %512 = vst.msk [vmem:[#allocation2 + $0x48] sm:$0xff] %vm498_vm1, %v497_v3  ;;  %511 = vst.msk [vmem:[#allocation2 + $0x40] sm:$0xff] %vm498_vm1, %v496_v4 }
 0x172   : > { %571 = vst.msk [vmem:[#allocation3] sm:$0xff] %vm570_vm2, %v547_v7 }
 0x173   : > { %527 = vst.msk [vmem:[#allocation3 + $0x60] sm:$0xff] %vm498_vm1, %v1760_v6  ;;  %526 = vst.msk [vmem:[#allocation3 + $0x50] sm:$0xff] %vm498_vm1, %v1758_v5  ;;  %v696_v10 = vld [vmem:[#allocation3 + $0x8] sm:$0xff]  ;;  %v629_v11 = vld [vmem:[#allocation2 + $0x18] sm:$0xff] }
 0x174   : > { %v633_v12 = vld [vmem:[#allocation2 + $0x38] sm:$0xff]  ;;  %1389 = vmatprep.mubr.msk.f32.mxu0 %vm498_vm1, %v696_v10  ;;  %645 = vrot.lane.b32.xlu1 %v629_v11, %s1528_s19  ;;  %524 = vst.msk [vmem:[#allocation3 + $0x30] sm:$0xff] %vm498_vm1, %v629_v11 }
 0x175   : > { %690 = vst.msk [vmem:[#allocation3 + $0x38] sm:$0xff] %vm498_vm1, %v633_v12  ;;  %528 = vst.msk [vmem:[#allocation3 + $0x70] sm:$0xff] %vm498_vm1, %v633_v12  ;;  %552 = vrot.lane.b32.xlu0 %v1738_v60, %s1529_s20 }
 0x177   : > { %v698_v37 = vld [vmem:[#allocation3 + $0x18] sm:$0xff]  ;;  %v700_v51 = vld [vmem:[#allocation3 + $0x28] sm:$0xff] }
 0x178   : > { %v684_v15 = vld [vmem:[#allocation2 + $0x48] sm:$0xff]  ;;  %v683_v16 = vld [vmem:[#allocation2 + $0x40] sm:$0xff]  ;;  %597 = vrot.lane.b32.xlu1 %v629_v11, %s1530_s9 }
 0x179   : > { %692 = vst.msk [vmem:[#allocation3 + $0x58] sm:$0xff] %vm498_vm1, %v684_v15  ;;  %691 = vst.msk [vmem:[#allocation3 + $0x48] sm:$0xff] %vm498_vm1, %v683_v16  ;;  %653 = vrot.lane.b32.xlu0 %v633_v12, %s1528_s19 }
 0x17c   : > { %v702_v19 = vld [vmem:[#allocation3 + $0x38] sm:$0xff]  ;;  %550 = vrot.lane.b32.xlu1 %v629_v11, %s1529_s20 }
 0x17d   : > { %1392 = vmatprep.mubr.msk.f32.mxu1 %vm498_vm1, %v702_v19  ;;  %605 = vrot.lane.b32.xlu0 %v633_v12, %s1530_s9 }
 0x180   : > { %595 = vrot.lane.b32.xlu1 %v1720_v53, %s1530_s9  ;;  %v704_v43 = vld [vmem:[#allocation3 + $0x48] sm:$0xff]  ;;  %v706_v47 = vld [vmem:[#allocation3 + $0x58] sm:$0xff] }
 0x181   : > { %558 = vrot.lane.b32.xlu0 %v633_v12, %s1529_s20 }
 0x184   : > { %548 = vrot.lane.b32.xlu1 %v1720_v53, %s1529_s20  ;;  %v708_v53 = vld [vmem:[#allocation3 + $0x68] sm:$0xff] }
 0x185   : > { %651 = vrot.lane.b32.xlu0 %v1760_v6, %s1528_s19 }
 0x188   : > { %601 = vrot.lane.b32.xlu1 %v1758_v5, %s1530_s9 }
 0x189   : > { %603 = vrot.lane.b32.xlu0 %v1760_v6, %s1530_s9 }
 0x18c   : > { %649 = vrot.lane.b32.xlu1 %v1758_v5, %s1528_s19 }
 0x18d   : > { %556 = vrot.lane.b32.xlu0 %v1760_v6, %s1529_s20 }
 0x190   : > { %647 = vrot.lane.b32.xlu1 %v1738_v60, %s1528_s19 }
 0x191   : > { %657 = vrot.lane.b32.xlu0 %v684_v15, %s1528_s19 }
 0x194   : > { %599 = vrot.lane.b32.xlu1 %v1738_v60, %s1530_s9  ;;  %v1531_v60 = vmov 0  }
 0x195   : > { %655 = vrot.lane.b32.xlu0 %v683_v16, %s1528_s19  ;;  %1501 = vset.pattern.permute.xlu1 %v1531_v60 }
 0x198   : > { %560 = vrot.lane.b32.xlu1 %v683_v16, %s1529_s20 }
 0x199   : > { %607 = vrot.lane.b32.xlu0 %v683_v16, %s1530_s9 }
 0x19c   : > { %659 = vrot.lane.b32.xlu1 %v1667_v28, %s1528_s19 }
 0x19d   : > { %609 = vrot.lane.b32.xlu0 %v684_v15, %s1530_s9 }
 0x1e2   : > { %v555_v23 = vpop.permute.xlu0 %554 }
 0x1e3   : > { %575 = vst.msk [vmem:[#allocation3 + $0x40] sm:$0xff] %vm570_vm2, %v555_v23 }
 0x1e6   : > { %v646_v24 = vpop.permute.xlu1 %645 }
 0x1e7   : > { %v553_v25 = vpop.permute.xlu0 %552 }
 0x1e8   : > { %574 = vst.msk [vmem:[#allocation3 + $0x30] sm:$0xff] %vm570_vm2, %v553_v25 }
 0x1ea   : > { %v598_v26 = vpop.permute.xlu1 %597 }
 0x1eb   : > { %v654_v27 = vpop.permute.xlu0 %653 }
 0x1ee   : > { %v551_v29 = vpop.permute.xlu1 %550 }
 0x1ef   : > { %573 = vst.msk [vmem:[#allocation3 + $0x20] sm:$0xff] %vm570_vm2, %v551_v29  ;;  %v606_v30 = vpop.permute.xlu0 %605  ;;  %v1907_v29 = vld [vmem:[%s2030_s4 + $0x3] ss:$0 sm:$0xff] }
 0x1f2   : > { %v596_v31 = vpop.permute.xlu1 %595 }
 0x1f3   : > { %620 = vst.msk [vmem:[#allocation3] sm:$0xff] %vm619_vm3, %v596_v31  ;;  %v559_v28 = vpop.permute.xlu0 %558 }
 0x1f4   : > { %670 = vst.msk [vmem:[#allocation3] sm:$0xff] %vm669_vm4, %v646_v24 }
 0x1f5   : > { %577 = vst.msk [vmem:[#allocation3 + $0x60] sm:$0xff] %vm570_vm2, %v559_v28 }
 0x1f6   : > { %v549_v32 = vpop.permute.xlu1 %548 }
 0x1f7   : > { %572 = vst.msk [vmem:[#allocation3 + $0x10] sm:$0xff] %vm570_vm2, %v549_v32  ;;  %v652_v33 = vpop.permute.xlu0 %651  ;;  %v1015_v32 = vmul.f32 %v1907_v29, %v888_v13 }
 0x1f8   : > { %621 = vst.msk [vmem:[#allocation3 + $0x10] sm:$0xff] %vm619_vm3, %v598_v26  ;;  %v918_v26 = vmul.f32 %v1895_v17, %v888_v13 }
 0x1fa   : > { %v602_v34 = vpop.permute.xlu1 %601 }
 0x1fb   : > { %623 = vst.msk [vmem:[#allocation3 + $0x30] sm:$0xff] %vm619_vm3, %v602_v34  ;;  %v604_v35 = vpop.permute.xlu0 %603  ;;  %v695_v36 = vld [vmem:[#allocation3] sm:$0xff] }
 0x1fc   : > { %673 = vst.msk [vmem:[#allocation3 + $0x30] sm:$0xff] %vm669_vm4, %v652_v33  ;;  %827 = vmatmul.mubr.f32.vlgmr.msra.gmra.mxu0 %v695_v36 }
 0x1fd   : > { %624 = vst.msk [vmem:[#allocation3 + $0x40] sm:$0xff] %vm619_vm3, %v604_v35  ;;  %1390 = vmatprep.mubr.msk.f32.mxu0 %vm498_vm1, %v698_v37  ;;  %v1921_v37 = vld [vmem:[%s2030_s4 + $0x2] ss:$0 sm:$0xff] }
 0x1fe   : > { %674 = vst.msk [vmem:[#allocation3 + $0x40] sm:$0xff] %vm669_vm4, %v654_v27  ;;  %v650_v38 = vpop.permute.xlu1 %649 }
 0x1ff   : > { %v557_v39 = vpop.permute.xlu0 %556 }
 0x200   : > { %576 = vst.msk [vmem:[#allocation3 + $0x50] sm:$0xff] %vm570_vm2, %v557_v39 }
 0x201   : > { %625 = vst.msk [vmem:[#allocation3 + $0x50] sm:$0xff] %vm619_vm3, %v606_v30  ;;  %v1912_v30 = vld [vmem:[%s2030_s4 + $0x4] ss:$0 sm:$0xff] }
 0x202   : > { %v648_v40 = vpop.permute.xlu1 %647 }
 0x203   : > { %671 = vst.msk [vmem:[#allocation3 + $0x10] sm:$0xff] %vm669_vm4, %v648_v40  ;;  %v658_v41 = vpop.permute.xlu0 %657  ;;  %v701_v42 = vld [vmem:[#allocation3 + $0x30] sm:$0xff] }
 0x204   : > { %842 = vmatmul.mubr.f32.vlgmr.msra.gmra.mxu1 %v701_v42 }
 0x205   : > { %1393 = vmatprep.mubr.msk.f32.mxu1 %vm498_vm1, %v704_v43  ;;  %v703_v46 = vld [vmem:[#allocation3 + $0x40] sm:$0xff] }
 0x206   : > { %v600_v44 = vpop.permute.xlu1 %599 }
 0x207   : > { %622 = vst.msk [vmem:[#allocation3 + $0x20] sm:$0xff] %vm619_vm3, %v600_v44  ;;  %v656_v45 = vpop.permute.xlu0 %655 }
 0x208   : > { %672 = vst.msk [vmem:[#allocation3 + $0x20] sm:$0xff] %vm669_vm4, %v650_v38  ;;  %675 = vst.msk [vmem:[#allocation3 + $0x50] sm:$0xff] %vm669_vm4, %v656_v45  ;;  %847 = vmatmul.mubr.f32.gmra.mxu1 %v703_v46  ;;  %v1926_v38 = vld [vmem:[%s2030_s4 + $0x5] ss:$0 sm:$0xff] }
 0x209   : > { %1394 = vmatprep.mubr.msk.f32.mxu1 %vm498_vm1, %v706_v47 }
 0x20a   : > { %v561_v48 = vpop.permute.xlu1 %560  ;;  %v697_v49 = vld [vmem:[#allocation3 + $0x10] sm:$0xff] }
 0x20b   : > { %578 = vst.msk [vmem:[#allocation3 + $0x70] sm:$0xff] %vm570_vm2, %v561_v48  ;;  %v608_v50 = vpop.permute.xlu0 %607  ;;  %832 = vmatmul.mubr.f32.gmra.mxu0 %v697_v49 }
 0x20c   : > { %626 = vst.msk [vmem:[#allocation3 + $0x60] sm:$0xff] %vm619_vm3, %v608_v50  ;;  %1391 = vmatprep.mubr.msk.f32.mxu0 %vm498_vm1, %v700_v51 }
 0x20d   : > { %676 = vst.msk [vmem:[#allocation3 + $0x60] sm:$0xff] %vm669_vm4, %v658_v41 }
 0x20e   : > { %v660_v52 = vpop.permute.xlu1 %659 }
 0x20f   : > { %v610_v54 = vpop.permute.xlu0 %609  ;;  %v705_v55 = vld [vmem:[#allocation3 + $0x50] sm:$0xff]  ;;  %v699_v56 = vld [vmem:[#allocation3 + $0x20] sm:$0xff] }
 0x210   : > { %627 = vst.msk [vmem:[#allocation3 + $0x70] sm:$0xff] %vm619_vm3, %v610_v54  ;;  %852 = vmatmul.mubr.f32.gmra.mxu1 %v705_v55  ;;  %837 = vmatmul.mubr.f32.gmra.mxu0 %v699_v56 }
 0x211   : > { %677 = vst.msk [vmem:[#allocation3 + $0x70] sm:$0xff] %vm669_vm4, %v660_v52  ;;  %1395 = vmatprep.mubr.msk.f32.mxu1 %vm498_vm1, %v708_v53 }
 0x214   : > { %v707_v58 = vld [vmem:[#allocation3 + $0x60] sm:$0xff] }
 0x215   : > { %857 = vmatmul.mubr.f32.gmra.mxu1 %v707_v58 }
 0x216   : > { %1396 = vmatprep.mubr.msk.f32.mxu1 %vm498_vm1, %v710_v57 }
 0x218   : > { %v709_v59 = vld [vmem:[#allocation3 + $0x70] sm:$0xff] }
 0x219   : > { %862 = vmatmul.mubr.f32.gmra.mxu1 %v709_v59 }
 0x2bc   : > { %v828_v62 = vpop.f32.mrf.mxu0 }
 0x2bd   : > { %v829_v63 = vadd.f32 %v1388_v61, %v828_v62 }
 0x2be   : > { %v830_v0 = vpop.f32.mrf.mxu0 }
 0x2bf   : > { %v867_v1 = vmax.f32 %v829_v63, 0.0 }
 0x2c1   : > { %880 = vst.msk [vmem:[#allocation4 + $0x8] sm:$0xff] %vm875_vm5, %v867_v1 }
 0x2c4   : > { %v843_v2 = vpop.f32.mrf.mxu1 }
 0x2c5   : > { %v844_v3 = vadd.f32 %v1388_v61, %v843_v2 }
 0x2c6   : > { %v845_v4 = vpop.f32.mrf.mxu1 }
 0x2c7   : > { %v870_v5 = vmax.f32 %v844_v3, 0.0 }
 0x2c8   : > { %v848_v6 = vpop.f32.mrf.mxu1  ;;  %v896_v16 = vld [vmem:[#allocation4 + $0x8] sm:$0xff] }
 0x2c9   : > { %883 = vst.msk [vmem:[#allocation4 + $0x20] sm:$0xff] %vm875_vm5, %v870_v5  ;;  %v849_v20 = vadd.f32 %v1388_v61, %v848_v6  ;;  %v931_v27 = vmul.f32 %v1900_v18, %v896_v16  ;;  %v1028_v33 = vmul.f32 %v1912_v30, %v896_v16  ;;  %v919_v44 = vmul.f32 %v1895_v17, %v896_v16 }
 0x2ca   : > { %v850_v7 = vpop.f32.mrf.mxu1  ;;  %v1016_v50 = vmul.f32 %v1907_v29, %v896_v16 }
 0x2cb   : > { %v871_v8 = vmax.f32 %v849_v20, 0.0  ;;  %v833_v9 = vpop.f32.mrf.mxu0  ;;  %v939_v36 = vadd.f32 %v931_v27, %v918_v26  ;;  %v1036_v47 = vadd.f32 %v1028_v33, %v1015_v32 }
 0x2cc   : > { %v834_v10 = vadd.f32 %v1388_v61, %v833_v9 }
 0x2cd   : > { %884 = vst.msk [vmem:[#allocation4 + $0x28] sm:$0xff] %vm875_vm5, %v871_v8  ;;  %v835_v11 = vpop.f32.mrf.mxu0 }
 0x2ce   : > { %v868_v12 = vmax.f32 %v834_v10, 0.0 }
 0x2d0   : > { %881 = vst.msk [vmem:[#allocation4 + $0x10] sm:$0xff] %vm875_vm5, %v868_v12  ;;  %v853_v14 = vpop.f32.mrf.mxu1  ;;  %v838_v15 = vpop.f32.mrf.mxu0  ;;  %v907_v57 = vld [vmem:[#allocation4 + $0x20] sm:$0xff] }
 0x2d1   : > { %v854_v19 = vadd.f32 %v1388_v61, %v853_v14  ;;  %v839_v21 = vadd.f32 %v1388_v61, %v838_v15  ;;  %v954_v4 = vmul.f32 %v1921_v37, %v907_v57  ;;  %v934_v6 = vmul.f32 %v1900_v18, %v907_v57 }
 0x2d2   : > { %v855_v22 = vpop.f32.mrf.mxu1  ;;  %v840_v23 = vpop.f32.mrf.mxu0  ;;  %v1051_v14 = vmul.f32 %v1926_v38, %v907_v57  ;;  %v1031_v15 = vmul.f32 %v1912_v30, %v907_v57 }
 0x2d3   : > { %v872_v24 = vmax.f32 %v854_v19, 0.0  ;;  %v869_v25 = vmax.f32 %v839_v21, 0.0  ;;  %v922_v21 = vmul.f32 %v1895_v17, %v907_v57 }
 0x2d4   : > { %v908_v5 = vld [vmem:[#allocation4 + $0x28] sm:$0xff] }
 0x2d5   : > { %885 = vst.msk [vmem:[#allocation4 + $0x30] sm:$0xff] %vm875_vm5, %v872_v24  ;;  %882 = vst.msk [vmem:[#allocation4 + $0x18] sm:$0xff] %vm875_vm5, %v869_v25  ;;  %v858_v31 = vpop.f32.mrf.mxu1  ;;  %v935_v16 = vmul.f32 %v1900_v18, %v908_v5  ;;  %v955_v19 = vmul.f32 %v1921_v37, %v908_v5 }
 0x2d6   : > { %v859_v28 = vadd.f32 %v1388_v61, %v858_v31  ;;  %v1032_v31 = vmul.f32 %v1912_v30, %v908_v5 }
 0x2d7   : > { %v860_v34 = vpop.f32.mrf.mxu1  ;;  %v905_v35 = vld [vmem:[#allocation4 + $0x10] sm:$0xff]  ;;  %v943_v32 = vadd.f32 %v935_v16, %v922_v21 }
 0x2d8   : > { %v873_v39 = vmax.f32 %v859_v28, 0.0  ;;  %v952_v40 = vmul.f32 %v1921_v37, %v905_v35  ;;  %v1049_v41 = vmul.f32 %v1926_v38, %v905_v35  ;;  %v932_v42 = vmul.f32 %v1900_v18, %v905_v35  ;;  %v1400_v16 = vld [vmem:[#allocation5] ss:$0 sm:$0xff] }
 0x2d9   : > { %v863_v43 = vpop.f32.mrf.mxu1  ;;  %v1029_v48 = vmul.f32 %v1912_v30, %v905_v35  ;;  %v920_v51 = vmul.f32 %v1895_v17, %v905_v35  ;;  %v1017_v0 = vmul.f32 %v1907_v29, %v905_v35  ;;  %v1052_v28 = vmul.f32 %v1926_v38, %v908_v5 }
 0x2da   : > { %886 = vst.msk [vmem:[#allocation4 + $0x38] sm:$0xff] %vm875_vm5, %v873_v39  ;;  %v864_v45 = vadd.f32 %v1388_v61, %v863_v43  ;;  %v960_v46 = vadd.f32 %v952_v40, %v939_v36  ;;  %v1057_v54 = vadd.f32 %v1049_v41, %v1036_v47  ;;  %v940_v56 = vadd.f32 %v932_v42, %v919_v44 }
 0x2db   : > { %v865_v49 = vpop.f32.mrf.mxu1  ;;  %v1037_v63 = vadd.f32 %v1029_v48, %v1016_v50  ;;  %v1019_v34 = vmul.f32 %v1907_v29, %v907_v57  ;;  %v923_v44 = vmul.f32 %v1895_v17, %v908_v5 }
 0x2dc   : > { %v874_v52 = vmax.f32 %v864_v45, 0.0  ;;  %v968_v53 = vsel %vm875_vm5, %v960_v46, 0.0  ;;  %v906_v55 = vld [vmem:[#allocation4 + $0x18] sm:$0xff]  ;;  %v1065_v20 = vsel %vm875_vm5, %v1057_v54, 0.0  ;;  %v909_v13 = vld [vmem:[#allocation4 + $0x30] sm:$0xff] }
 0x2dd   : > { %969 = vadd.xlane.f32.xlu0 %v968_v53  ;;  %v953_v58 = vmul.f32 %v1921_v37, %v906_v55  ;;  %v1050_v59 = vmul.f32 %v1926_v38, %v906_v55  ;;  %v933_v61 = vmul.f32 %v1900_v18, %v906_v55  ;;  %v1030_v62 = vmul.f32 %v1912_v30, %v906_v55 }
 0x2de   : > { %887 = vst.msk [vmem:[#allocation4 + $0x40] sm:$0xff] %vm875_vm5, %v874_v52  ;;  %v921_v1 = vmul.f32 %v1895_v17, %v906_v55  ;;  %v1018_v9 = vmul.f32 %v1907_v29, %v906_v55  ;;  %v956_v25 = vmul.f32 %v1921_v37, %v909_v13  ;;  %v1053_v35 = vmul.f32 %v1926_v38, %v909_v13 }
 0x2df   : > { %v961_v2 = vadd.f32 %v953_v58, %v940_v56  ;;  %v941_v3 = vadd.f32 %v933_v61, %v920_v51  ;;  %v1058_v7 = vadd.f32 %v1050_v59, %v1037_v63  ;;  %v1038_v8 = vadd.f32 %v1030_v62, %v1017_v0  ;;  %v912_v62 = vld [vmem:[#allocation4 + $0x48] sm:$0xff] }
 0x2e0   : > { %v942_v12 = vadd.f32 %v934_v6, %v921_v1  ;;  %v1039_v24 = vadd.f32 %v1031_v15, %v1018_v9  ;;  %v936_v36 = vmul.f32 %v1900_v18, %v909_v13  ;;  %v964_v41 = vadd.f32 %v956_v25, %v943_v32 }
 0x2e1   : > { %1066 = vadd.xlane.f32.xlu0 %v1065_v20  ;;  %v971_v10 = vsel %vm875_vm5, %v961_v2, 0.0  ;;  %v962_v11 = vadd.f32 %v954_v4, %v941_v3  ;;  %v1068_v22 = vsel %vm875_vm5, %v1058_v7, 0.0  ;;  %v1059_v23 = vadd.f32 %v1051_v14, %v1038_v8  ;;  %v910_v33 = vld [vmem:[#allocation4 + $0x38] sm:$0xff] }
 0x2e2   : > { %972 = vadd.xlane.f32.xlu1 %v971_v10  ;;  %v963_v27 = vadd.f32 %v955_v19, %v942_v12  ;;  %v1060_v40 = vadd.f32 %v1052_v28, %v1039_v24  ;;  %v1040_v43 = vadd.f32 %v1032_v31, %v1019_v34  ;;  %v957_v45 = vmul.f32 %v1921_v37, %v910_v33 }
 0x2e3   : > { %v974_v26 = vsel %vm875_vm5, %v962_v11, 0.0  ;;  %v1071_v39 = vsel %vm875_vm5, %v1059_v23, 0.0  ;;  %v1033_v46 = vmul.f32 %v1912_v30, %v909_v13  ;;  %v944_v49 = vadd.f32 %v936_v36, %v923_v44 }
 0x2e4   : > { %v977_v42 = vsel %vm875_vm5, %v963_v27, 0.0  ;;  %v1061_v48 = vadd.f32 %v1053_v35, %v1040_v43  ;;  %v937_v50 = vmul.f32 %v1900_v18, %v910_v33  ;;  %v1074_v51 = vsel %vm875_vm5, %v1060_v40, 0.0 }
 0x2e5   : > { %1069 = vadd.xlane.f32.xlu0 %v1068_v22  ;;  %v911_v47 = vld [vmem:[#allocation4 + $0x40] sm:$0xff]  ;;  %v980_v52 = vsel %vm875_vm5, %v964_v41, 0.0  ;;  %v1020_v53 = vmul.f32 %v1907_v29, %v908_v5  ;;  %v1054_v54 = vmul.f32 %v1926_v38, %v910_v33  ;;  %v965_v55 = vadd.f32 %v957_v45, %v944_v49 }
 0x2e6   : > { %975 = vadd.xlane.f32.xlu1 %v974_v26  ;;  %v924_v56 = vmul.f32 %v1895_v17, %v909_v13  ;;  %v958_v57 = vmul.f32 %v1921_v37, %v911_v47  ;;  %v938_v58 = vmul.f32 %v1900_v18, %v911_v47  ;;  %v1034_v61 = vmul.f32 %v1912_v30, %v910_v33 }
 0x2e7   : > { %v1041_v59 = vadd.f32 %v1033_v46, %v1020_v53  ;;  %v1077_v63 = vsel %vm875_vm5, %v1061_v48, 0.0  ;;  %v925_v1 = vmul.f32 %v1895_v17, %v910_v33  ;;  %v1021_v3 = vmul.f32 %v1907_v29, %v909_v13 }
 0x2e8   : > { %v945_v0 = vadd.f32 %v937_v50, %v924_v56  ;;  %v1055_v4 = vmul.f32 %v1926_v38, %v911_v47  ;;  %v1035_v5 = vmul.f32 %v1912_v30, %v911_v47  ;;  %v983_v18 = vsel %vm875_vm5, %v965_v55, 0.0 }
 0x2e9   : > { %1072 = vadd.xlane.f32.xlu0 %v1071_v39  ;;  %v1062_v2 = vadd.f32 %v1054_v54, %v1041_v59  ;;  %v946_v20 = vadd.f32 %v938_v58, %v925_v1  ;;  %v959_v7 = vmul.f32 %v1921_v37, %v912_v62  ;;  %v1042_v8 = vadd.f32 %v1034_v61, %v1021_v3 }
 0x2ea   : > { %978 = vadd.xlane.f32.xlu1 %v977_v42  ;;  %v966_v6 = vadd.f32 %v958_v57, %v945_v0  ;;  %v1022_v9 = vmul.f32 %v1907_v29, %v910_v33  ;;  %v1056_v12 = vmul.f32 %v1926_v38, %v912_v62  ;;  %v1105_v32 = vlaneseq }
 0x2eb   : > { %v1080_v17 = vsel %vm875_vm5, %v1062_v2, 0.0  ;;  %v1063_v10 = vadd.f32 %v1055_v4, %v1042_v8  ;;  %v967_v13 = vadd.f32 %v959_v7, %v946_v20 }
 0x2ec   : > { %v1043_v11 = vadd.f32 %v1035_v5, %v1022_v9  ;;  %v986_v30 = vsel %vm875_vm5, %v966_v6, 0.0  ;;  %v1106_v35 = vand.u32 127, %v1105_v32  ;;  %v1108_v36 = vshrl.u32 %v1105_v32, 7 }
 0x2ed   : > { %1075 = vadd.xlane.f32.xlu0 %v1074_v51  ;;  %v1083_v14 = vsel %vm875_vm5, %v1063_v10, 0.0  ;;  %v989_v37 = vsel %vm875_vm5, %v967_v13, 0.0 }
 0x2ee   : > { %981 = vadd.xlane.f32.xlu1 %v980_v52  ;;  %v1064_v15 = vadd.f32 %v1056_v12, %v1043_v11  ;;  %v1109_v40 = vsub.s32 %v1106_v35, %v1108_v36 }
 0x2f0   : > { %v1086_v29 = vsel %vm875_vm5, %v1064_v15, 0.0 }
 0x2f1   : > { %1078 = vadd.xlane.f32.xlu0 %v1077_v63 }
 0x2f2   : > { %984 = vadd.xlane.f32.xlu1 %v983_v18 }
 0x2f5   : > { %1081 = vadd.xlane.f32.xlu0 %v1080_v17 }
 0x2f6   : > { %987 = vadd.xlane.f32.xlu1 %v986_v30 }
 0x2f9   : > { %1084 = vadd.xlane.f32.xlu0 %v1083_v14 }
 0x2fa   : > { %990 = vadd.xlane.f32.xlu1 %v989_v37 }
 0x2fd   : > { %1087 = vadd.xlane.f32.xlu0 %v1086_v29 }
 0x30b   : > { %999 = vperm.xlu1 %1501, %v1400_v16  }
 0x366   : > { %v970_v19 = vpop.xlane.xlu0 %969 }
 0x36a   : > { %v1067_v21 = vpop.xlane.xlu0 %1066 }
 0x36b   : > { %v973_v38 = vpop.xlane.xlu1 %972 }
 0x36e   : > { %v1070_v22 = vpop.xlane.xlu0 %1069 }
 0x36f   : > { %v976_v23 = vpop.xlane.xlu1 %975 }
 0x372   : > { %v1073_v24 = vpop.xlane.xlu0 %1072 }
 0x373   : > { %v979_v25 = vpop.xlane.xlu1 %978 }
 0x376   : > { %v1076_v26 = vpop.xlane.xlu0 %1075 }
 0x377   : > { %v982_v27 = vpop.xlane.xlu1 %981 }
 0x37a   : > { %v1079_v28 = vpop.xlane.xlu0 %1078 }
 0x37b   : > { %v985_v31 = vpop.xlane.xlu1 %984 }
 0x37e   : > { %v1082_v34 = vpop.xlane.xlu0 %1081 }
 0x37f   : > { %v988_v33 = vpop.xlane.xlu1 %987 }
 0x382   : > { %v1085_v42 = vpop.xlane.xlu0 %1084 }
 0x383   : > { %v991_v39 = vpop.xlane.xlu1 %990 }
 0x386   : > { %v1088_v0 = vpop.xlane.xlu0 %1087 }
 0x387   : > { %v1000_v41 = vpop.permute.xlu1 %999 }
 0x388   : > { %v1002_v43 = vadd.f32 %v1000_v41, %v970_v19  ;;  %v1003_v44 = vadd.f32 %v1000_v41, %v973_v38  ;;  %v1004_v45 = vadd.f32 %v1000_v41, %v976_v23  ;;  %v1005_v46 = vadd.f32 %v1000_v41, %v979_v25 }
 0x389   : > { %v1006_v47 = vadd.f32 %v1000_v41, %v982_v27  ;;  %v1007_v48 = vadd.f32 %v1000_v41, %v985_v31  ;;  %v1008_v49 = vadd.f32 %v1000_v41, %v988_v33  ;;  %v1009_v53 = vadd.f32 %v1000_v41, %v991_v39 }
 0x38a   : > { %v1110_v50 = vrot.slane %v1002_v43, %v1109_v40  ;;  %v1114_v51 = vrot.slane %v1003_v44, %v1109_v40  ;;  %v1118_v52 = vrot.slane %v1004_v45, %v1109_v40  ;;  %v1122_v54 = vrot.slane %v1005_v46, %v1109_v40 }
 0x38b   : > { %v1089_v56 = vadd.f32 %v1067_v21, %v1000_v41  ;;  %v1090_v57 = vadd.f32 %v1070_v22, %v1000_v41  ;;  %v1091_v58 = vadd.f32 %v1073_v24, %v1000_v41  ;;  %v1126_v59 = vrot.slane %v1006_v47, %v1109_v40 }
 0x38c   : > { %v1140_v55 = vsel %vm1139_vm6, %v1114_v51, %v1110_v50  ;;  %v1130_v61 = vrot.slane %v1007_v48, %v1109_v40  ;;  %v1092_v63 = vadd.f32 %v1076_v26, %v1000_v41  ;;  %v1134_v1 = vrot.slane %v1008_v49, %v1109_v40 }
 0x38d   : > { %v1142_v62 = vsel %vm1141_vm7, %v1118_v52, %v1140_v55  ;;  %v1093_v3 = vadd.f32 %v1079_v28, %v1000_v41  ;;  %v1198_v4 = vrot.slane %v1089_v56, %v1109_v40  ;;  %v1094_v18 = vadd.f32 %v1082_v34, %v1000_v41 }
 0x38e   : > { %v1144_v2 = vsel %vm1143_vm8, %v1122_v54, %v1142_v62  ;;  %v1202_v6 = vrot.slane %v1090_v57, %v1109_v40  ;;  %v1206_v20 = vrot.slane %v1091_v58, %v1109_v40  ;;  %v1138_v7 = vrot.slane %v1009_v53, %v1109_v40 }
 0x38f   : > { %v1146_v5 = vsel %vm1145_vm9, %v1126_v59, %v1144_v2  ;;  %v1095_v9 = vadd.f32 %v1085_v42, %v1000_v41  ;;  %v1096_v10 = vadd.f32 %v1088_v0, %v1000_v41  ;;  %v1210_v11 = vrot.slane %v1092_v63, %v1109_v40 }
 0x390   : > { %v1148_v8 = vsel %vm1147_vm10, %v1130_v61, %v1146_v5  ;;  %v1227_v12 = vsel %vm1139_vm6, %v1202_v6, %v1198_v4  ;;  %v1214_v13 = vrot.slane %v1093_v3, %v1109_v40  ;;  %v1218_v15 = vrot.slane %v1094_v18, %v1109_v40 }
 0x391   : > { %v1150_v17 = vsel %vm1149_vm11, %v1134_v1, %v1148_v8  ;;  %v1228_v14 = vsel %vm1141_vm7, %v1206_v20, %v1227_v12  ;;  %v1222_v29 = vrot.slane %v1095_v9, %v1109_v40  ;;  %v1226_v19 = vrot.slane %v1096_v10, %v1109_v40 }
 0x392   : > { %v1152_v30 = vsel %vm1151_vm12, %v1138_v7, %v1150_v17  ;;  %v1229_v37 = vsel %vm1143_vm8, %v1210_v11, %v1228_v14 }
 0x393   : > { %1154 = vxpose.xlu0.b32.start.end [1/1] (short) (narrow) %v1152_v30, 8  ;;  %v1230_v16 = vsel %vm1145_vm9, %v1214_v13, %v1229_v37 }
 0x394   : > { %v1231_v21 = vsel %vm1147_vm10, %v1218_v15, %v1230_v16 }
 0x395   : > { %v1232_v38 = vsel %vm1149_vm11, %v1222_v29, %v1231_v21 }
 0x396   : > { %v1233_v22 = vsel %vm1151_vm12, %v1226_v19, %v1232_v38 }
 0x397   : > { %1235 = vxpose.xlu1.b32.start.end [1/1] (short) (narrow) %v1233_v22, 8 }
 0x3bc   : > { %1502 = vset.pattern.permute.xlu0 %v1531_v60 }
 0x40f   : > { %v1170_v23 = vpop.trf.xlu0 }
 0x410   : > { %1186 = vst.msk [vmem:[%s310_s12] sm:$0xff] %vm320_vm0, %v1170_v23  ;;  %1275 = sbr.rel (!%p1600_p5) target bundleno = 1053 (0x41d), region = 86 }
 0x413   : > { %v1251_v24 = vpop.trf.xlu1 }
 0x414   : > { %1404 = vst.msk [vmem:[%s310_s12 + $0x8] sm:$0xff] %vm320_vm0, %v1251_v24 }
 0x417   : > { %v1308_v25 = vld [vmem:[%s310_s12] sm:$0xff] }
 0x418   : > { %1309 = vst [vmem:[%s1277_s23] sm:$0xff] %v1308_v25 }
 0x41b   : > { %v1310_v26 = vld [vmem:[%s310_s12 + $0x8] sm:$0xff] }
 0x41c   : > { %1311 = vst [vmem:[%s1277_s23 + $0x10] sm:$0xff] %v1310_v26 }
 0x41d PF: > { %p15_p10 = scmp.ge.s32.totalorder %s1587_s26, 4   ;;  %s2034_s23 = smov %s1521_s24 }
 0x41e   : > { %s2035_s24 = smov %s1598_s29  ;;  %s2036_s25 = smov %s1587_s26 }
 0x41f   :  { %17 = sbr.rel (!%p15_p10) target bundleno = 5 (0x5), region = 164 }

</bundles_post_ra>
